<compile_context>
chip_gen: v6e
topology: v6e:2x2x1
jax: 0.10.0
libtpu: 0.0.40
codegen_flags: <defaults>
</compile_context>

<pallas_src>
import functools
import math

import jax
import jax.numpy as jnp
from jax.experimental import pallas as pl
from jax.experimental.pallas import tpu as pltpu


def _arc_margin_kernel(label_ref, cosine_ref, loss_ref, *,
                       scale, cos_m, sin_m, th, mmm, easy_margin):
    # cosine tile: (TB, C) ; label tile: (TB, 1) int32 ; loss tile: (TB, 1) f32
    c = cosine_ref[...].astype(jnp.float32)
    lbl = label_ref[...]                                          # (TB, 1)

    col = jax.lax.broadcasted_iota(jnp.int32, c.shape, 1)         # (TB, C)
    one_hot = col == lbl                                          # (TB, C) bool

    # Per-row target cosine via masked sum -> (TB, 1). (Only full-width select.)
    c_t = jnp.sum(jnp.where(one_hot, c, 0.0), axis=-1, keepdims=True)

    # Margin transform on the (TB, 1) target column only (negligible work).
    sine_t = jnp.sqrt(jnp.maximum(1.0 - c_t * c_t, 0.0))          # clamp vs. rounding
    phi_t = c_t * cos_m - sine_t * sin_m
    if easy_margin:
        phi_t = jnp.where(c_t > 0.0, phi_t, c_t)
    else:
        phi_t = jnp.where(c_t > th, phi_t, c_t - mmm)

    # logsumexp of the corrected scaled row.  phi_t <= c_t, so max(c) remains a
    # valid stabilizer for every corrected logit.  Fuse the scale into the
    # exp argument so no (TB, C) scaled-logit temporary is materialized.
    m_c = jnp.max(c, axis=-1, keepdims=True)                      # XLU reduce
    e = jnp.exp((c - m_c) * scale)                                # VPU sub+mul, EUP exp
    sum_e = jnp.sum(e, axis=-1, keepdims=True)                    # XLU reduce
    sum_e = (sum_e
             - jnp.exp((c_t - m_c) * scale)
             + jnp.exp((phi_t - m_c) * scale))                    # (TB,1) correction
    lse = m_c * scale + jnp.log(sum_e)

    # per-row cross-entropy: logsumexp(corrected logits) - corrected_target_logit
    loss_ref[...] = lse - phi_t * scale


def _vmem_limit_bytes():
    """Scoped-VMEM limit: raised above the default but clamped below physical."""
    desired = 64 * 1024 * 1024
    try:
        cap = int(pltpu.get_tpu_info().vmem_capacity_bytes)
    except Exception:  # pragma: no cover - conservative fallback
        cap = 64 * 1024 * 1024
    return min(desired, max(16 * 1024 * 1024, (cap * 3) // 4))


def _pick_batch_tile(B, C, vmem_limit):
    """Pick (batch_tile, padded_B).

    Largest multiple-of-8 tile whose double-buffered f32 cosine block fits in
    ~half the scoped VMEM budget (capped at 512 rows).  Prefer an exact divisor
    of B so no padding is needed; otherwise pad B up to a tile multiple."""
    budget = vmem_limit // 2                  # headroom for labels/output/temps
    cap = budget // (2 * C * 4)               # 2 buffers * rows * C * 4B <= budget
    cap = int(min(max(cap, 8), 512))

    if B % 8 == 0:
        best = None
        for cand in range(8, min(cap, B) + 1, 8):
            if B % cand == 0:
                best = cand
        if best is not None:
            return best, B

    tile = min(cap, ((B + 7) // 8) * 8)
    tile = max(8, (tile // 8) * 8)
    b_pad = ((B + tile - 1) // tile) * tile
    return tile, b_pad


def arc_margin_loss(cosine, label, *, scale=32.0, margin=0.2,
                    easy_margin=False, batch_tile=None):
    """ArcMarginLoss.forward: returns scalar mean cross-entropy loss."""
    B, C = cosine.shape
    cos_m = math.cos(margin)
    sin_m = math.sin(margin)
    th = math.cos(math.pi - margin)
    mmm = 1.0 + math.cos(math.pi - margin)

    vmem_limit = _vmem_limit_bytes()
    if batch_tile is None:
        batch_tile, b_pad = _pick_batch_tile(B, C, vmem_limit)
    else:
        b_pad = ((B + batch_tile - 1) // batch_tile) * batch_tile
    assert b_pad % batch_tile == 0

    label2d = label.astype(jnp.int32).reshape(B, 1)
    if b_pad != B:
        cosine_in = jnp.concatenate(
            [cosine, jnp.zeros((b_pad - B, C), cosine.dtype)], axis=0)
        label_in = jnp.concatenate(
            [label2d, jnp.zeros((b_pad - B, 1), jnp.int32)], axis=0)
    else:
        cosine_in, label_in = cosine, label2d

    kernel = functools.partial(
        _arc_margin_kernel,
        scale=float(scale), cos_m=cos_m, sin_m=sin_m,
        th=th, mmm=mmm, easy_margin=easy_margin)

    per_row = pl.pallas_call(
        kernel,
        out_shape=jax.ShapeDtypeStruct((b_pad, 1), jnp.float32),
        grid_spec=pltpu.PrefetchScalarGridSpec(
            num_scalar_prefetch=0,
            grid=(b_pad // batch_tile,),
            in_specs=[
                pl.BlockSpec((batch_tile, 1), lambda i: (i, 0)),   # labels
                pl.BlockSpec((batch_tile, C), lambda i: (i, 0)),   # cosine
            ],
            out_specs=pl.BlockSpec((batch_tile, 1), lambda i: (i, 0)),
        ),
        compiler_params=pltpu.CompilerParams(
            dimension_semantics=("parallel",),
            vmem_limit_bytes=vmem_limit),
    )(label_in, cosine_in)

    # nn.CrossEntropyLoss default reduction='mean' (only over the real rows).
    return jnp.mean(per_row[:B, 0])


def _reference(cosine, label, *, scale=32.0, margin=0.2, easy_margin=False):
    """Pure-JAX reference mirroring the PyTorch forward (for sanity)."""
    cos_m = math.cos(margin)
    sin_m = math.sin(margin)
    th = math.cos(math.pi - margin)
    mmm = 1.0 + math.cos(math.pi - margin)
    c = cosine.astype(jnp.float32)
    sine = jnp.sqrt(1.0 - c * c)
    phi = c * cos_m - sine * sin_m
    phi = jnp.where(c > 0.0, phi, c) if easy_margin else jnp.where(c > th, phi, c - mmm)
    one_hot = jax.nn.one_hot(label, c.shape[1], dtype=c.dtype)
    out = (one_hot * phi + (1.0 - one_hot) * c) * scale
    logp = jax.nn.log_softmax(out, axis=-1)
    return -jnp.mean(jnp.take_along_axis(logp, label[:, None], axis=1))


if __name__ == "__main__":
    key = jax.random.PRNGKey(0)

    # Case 1: batch multiple of 8, hard margin (matches kws default config).
    k1c, k1l, k2c, k2l = jax.random.split(key, 4)
    B1, C1 = 8, 128
    cosine1 = jax.random.uniform(k1c, (B1, C1), dtype=jnp.float32,
                                 minval=-1.0, maxval=1.0)
    label1 = jax.random.randint(k1l, (B1,), 0, C1, dtype=jnp.int32)
    loss1 = jax.block_until_ready(
        arc_margin_loss(cosine1, label1, scale=32.0, margin=0.2,
                        easy_margin=False))
    ref1 = _reference(cosine1, label1, scale=32.0, margin=0.2, easy_margin=False)
    assert jnp.allclose(loss1, ref1, atol=1e-4, rtol=1e-4), (loss1, ref1)

    # Case 2: ragged batch (exercises padding path) + easy_margin.
    B2, C2 = 12, 256
    cosine2 = jax.random.uniform(k2c, (B2, C2), dtype=jnp.float32,
                                 minval=-1.0, maxval=1.0)
    label2 = jax.random.randint(k2l, (B2,), 0, C2, dtype=jnp.int32)
    loss2 = jax.block_until_ready(
        arc_margin_loss(cosine2, label2, scale=32.0, margin=0.2,
                        easy_margin=True))
    ref2 = _reference(cosine2, label2, scale=32.0, margin=0.2, easy_margin=True)
    assert jnp.allclose(loss2, ref2, atol=1e-4, rtol=1e-4), (loss2, ref2)

    print("KERNEL_OK")
</pallas_src>

<mosaic_0001>
module attributes {stable_mosaic.version = 11 : i64} {
  func.func @_arc_margin_kernel(%arg0: i32, %arg1: memref<8x1xi32, #tpu.memory_space<vmem>>, %arg2: memref<8x128xf32, #tpu.memory_space<vmem>>, %arg3: memref<8x1xf32, #tpu.memory_space<vmem>>) attributes {dimension_semantics = [#tpu.dimension_semantics<parallel>], iteration_bounds = array<i64: 1>, scalar_prefetch = 0 : i64, scratch_operands = 0 : i64, tpu.core_type = #tpu.core_type<tc>, window_params = [{transform_indices = @transform_0, window_bounds = array<i64: 8, 1>}, {transform_indices = @transform_1, window_bounds = array<i64: 8, 128>}, {transform_indices = @transform_2, window_bounds = array<i64: 8, 1>}]} {
    %c0 = arith.constant 0 : index
    %c0_0 = arith.constant 0 : index
    %0 = vector.load %arg2[%c0, %c0_0] : memref<8x128xf32, #tpu.memory_space<vmem>>, vector<8x128xf32>
    %c0_1 = arith.constant 0 : index
    %c0_2 = arith.constant 0 : index
    %1 = vector.load %arg1[%c0_1, %c0_2] : memref<8x1xi32, #tpu.memory_space<vmem>>, vector<8x1xi32>
    %2 = tpu.iota {dimensions = array<i32: 1>} : vector<8x128xi32>
    %3 = vector.broadcast %1 : vector<8x1xi32> to vector<8x128xi32>
    %4 = arith.cmpi eq, %2, %3 : vector<8x128xi32>
    %cst = arith.constant 0.000000e+00 : f32
    %5 = vector.broadcast %cst : f32 to vector<8x128xf32>
    %6 = arith.select %4, %0, %5 : vector<8x128xi1>, vector<8x128xf32>
    %cst_3 = arith.constant dense<0.000000e+00> : vector<8xf32>
    %7 = vector.multi_reduction <add>, %6, %cst_3 [1] : vector<8x128xf32> to vector<8xf32>
    %8 = vector.shape_cast %7 : vector<8xf32> to vector<8x1xf32>
    %9 = arith.mulf %8, %8 : vector<8x1xf32>
    %cst_4 = arith.constant 1.000000e+00 : f32
    %10 = vector.broadcast %cst_4 : f32 to vector<8x1xf32>
    %11 = arith.subf %10, %9 : vector<8x1xf32>
    %cst_5 = arith.constant 0.000000e+00 : f32
    %12 = vector.broadcast %cst_5 : f32 to vector<8x1xf32>
    %13 = arith.maximumf %11, %12 : vector<8x1xf32>
    %14 = math.sqrt %13 : vector<8x1xf32>
    %cst_6 = arith.constant 0.980066597 : f32
    %15 = vector.broadcast %cst_6 : f32 to vector<8x1xf32>
    %16 = arith.mulf %8, %15 : vector<8x1xf32>
    %cst_7 = arith.constant 0.198669329 : f32
    %17 = vector.broadcast %cst_7 : f32 to vector<8x1xf32>
    %18 = arith.mulf %14, %17 : vector<8x1xf32>
    %19 = arith.subf %16, %18 : vector<8x1xf32>
    %cst_8 = arith.constant -0.980066597 : f32
    %20 = vector.broadcast %cst_8 : f32 to vector<8x1xf32>
    %21 = arith.cmpf ogt, %8, %20 : vector<8x1xf32>
    %cst_9 = arith.constant 0.019933423 : f32
    %22 = vector.broadcast %cst_9 : f32 to vector<8x1xf32>
    %23 = arith.subf %8, %22 : vector<8x1xf32>
    %24 = arith.select %21, %19, %23 : vector<8x1xi1>, vector<8x1xf32>
    %cst_10 = arith.constant dense<0xFF800000> : vector<8xf32>
    %25 = vector.multi_reduction <maximumf>, %0, %cst_10 [1] : vector<8x128xf32> to vector<8xf32>
    %26 = vector.shape_cast %25 : vector<8xf32> to vector<8x1xf32>
    %27 = vector.broadcast %26 : vector<8x1xf32> to vector<8x128xf32>
    %28 = arith.subf %0, %27 : vector<8x128xf32>
    %cst_11 = arith.constant 3.200000e+01 : f32
    %29 = vector.broadcast %cst_11 : f32 to vector<8x128xf32>
    %30 = arith.mulf %28, %29 : vector<8x128xf32>
    %31 = math.exp %30 : vector<8x128xf32>
    %cst_12 = arith.constant dense<0.000000e+00> : vector<8xf32>
    %32 = vector.multi_reduction <add>, %31, %cst_12 [1] : vector<8x128xf32> to vector<8xf32>
    %33 = vector.shape_cast %32 : vector<8xf32> to vector<8x1xf32>
    %34 = arith.subf %8, %26 : vector<8x1xf32>
    %cst_13 = arith.constant 3.200000e+01 : f32
    %35 = vector.broadcast %cst_13 : f32 to vector<8x1xf32>
    %36 = arith.mulf %34, %35 : vector<8x1xf32>
    %37 = math.exp %36 : vector<8x1xf32>
    %38 = arith.subf %33, %37 : vector<8x1xf32>
    %39 = arith.subf %24, %26 : vector<8x1xf32>
    %cst_14 = arith.constant 3.200000e+01 : f32
    %40 = vector.broadcast %cst_14 : f32 to vector<8x1xf32>
    %41 = arith.mulf %39, %40 : vector<8x1xf32>
    %42 = math.exp %41 : vector<8x1xf32>
    %43 = arith.addf %38, %42 : vector<8x1xf32>
    %cst_15 = arith.constant 3.200000e+01 : f32
    %44 = vector.broadcast %cst_15 : f32 to vector<8x1xf32>
    %45 = arith.mulf %26, %44 : vector<8x1xf32>
    %46 = math.log %43 : vector<8x1xf32>
    %47 = arith.addf %45, %46 : vector<8x1xf32>
    %cst_16 = arith.constant 3.200000e+01 : f32
    %48 = vector.broadcast %cst_16 : f32 to vector<8x1xf32>
    %49 = arith.mulf %24, %48 : vector<8x1xf32>
    %50 = arith.subf %47, %49 : vector<8x1xf32>
    %c0_17 = arith.constant 0 : index
    %c0_18 = arith.constant 0 : index
    %51 = vector.load %arg3[%c0_17, %c0_18] : memref<8x1xf32, #tpu.memory_space<vmem>>, vector<8x1xf32>
    tpu.vector_store %arg3[%c0_17, %c0_18], %50 {strides = array<i32>} : memref<8x1xf32, #tpu.memory_space<vmem>>, vector<8x1xf32>,
    return
  }
  func.func @transform_0(%arg0: i32) -> (i32, i32) {
    %c0_i32 = arith.constant 0 : i32
    %c0_i32_0 = arith.constant 0 : i32
    return %arg0, %c0_i32 : i32, i32
  }
  func.func @transform_1(%arg0: i32) -> (i32, i32) {
    %c0_i32 = arith.constant 0 : i32
    %c0_i32_0 = arith.constant 0 : i32
    return %arg0, %c0_i32 : i32, i32
  }
  func.func @transform_2(%arg0: i32) -> (i32, i32) {
    %c0_i32 = arith.constant 0 : i32
    %c0_i32_0 = arith.constant 0 : i32
    return %arg0, %c0_i32 : i32, i32
  }
}

</mosaic_0001>

<bundles_post_ra>
// kernel: tpu_custom_call.1
= control target key start
LH: loop header
LB: loop body
LE: loop exit
PB: predicated region body
PF: predicated region fallthrough
CT: control target
= control target key end

     0   :  { %v81_v0 = vmov 0   ;;  %v13_v3 = vlaneseq  ;;  %vm62_vm4 = vcmask 7168   ;;  %s106_s0 = inlined_call_operand.vmem [shape: s32[8,1], index: 0, kind: input, shape index: {}]   ;;  %s107_s1 = inlined_call_operand.vmem [shape: f32[8,128], index: 1, kind: input, shape index: {}]   ;;  %s108_s2 = inlined_call_operand.vmem [shape: f32[8,1], index: 2, kind: output, shape index: {}]  }
   0x1   :  { %70 = vset.pattern.permute.xlu0 %v81_v0  ;;  %v12_v1 = vld [vmem:[%s106_s0] sm:$0xff] }
   0x2   :  { %16 = vperm.xlu0 %70, %v12_v1   ;;  %v11_v2 = vld [vmem:[%s107_s1] sm:$0xff]  ;;  %v14_v4 = vand.u32 127, %v13_v3 }
  0x21   :  { %38 = vmax.xlane.f32.xlu0 %v11_v2 }
  0x7d   :  { %v17_v5 = vpop.permute.xlu0 %16 }
  0x7e   :  { %vm18_vm0 = vcmp.eq.s32.totalorder %v14_v4, %v17_v5 }
  0x7f   :  { %v19_v6 = vsel %vm18_vm0, %v11_v2, 0.0 }
  0x80   :  { %20 = vadd.xlane.f32.xlu1 %v19_v6 }
  0xaa   :  { %v39_v7 = vpop.xlane.xlu0 %38 }
  0xab   :  { %v40_v8 = vsub.f32 %v11_v2, %v39_v7  ;;  %v56_v38 = vmul.f32 32.0, %v39_v7 }
  0xad   :  { %v41_v9 = vmul.f32 32.0, %v40_v8 }
  0xaf   :  { %v42_v10 = vmul.f32 1.442695, %v41_v9 }
  0xb1   :  { %71 = vpow2.f32 %v42_v10 }
  0xbe   :  { %v72_v11 = vpop.eup %71 }
  0xbf   :  { %44 = vadd.xlane.f32.xlu1 %v72_v11 }
 0x109   :  { %v21_v12 = vpop.xlane.xlu1 %20 }
 0x10a   :  { %v22_v13 = vmul.f32 %v21_v12, %v21_v12  ;;  %v32_v22 = vmul.f32 0.9800666, %v21_v12  ;;  %v68_v24 = vadd.f32 -0.019933423, %v21_v12  ;;  %vm35_vm3 = vcmp.gt.f32.partialorder %v21_v12, -0.9800666 }
 0x10b   :  { %v46_v26 = vsub.f32 %v21_v12, %v39_v7 }
 0x10c   :  { %v23_v14 = vsub.f32 1.0, %v22_v13 }
 0x10d   :  { %v47_v28 = vmul.f32 32.0, %v46_v26 }
 0x10e   :  { %v24_v15 = vmax.f32 %v23_v14, 0.0 }
 0x10f   :  { %v48_v30 = vmul.f32 1.442695, %v47_v28 }
 0x110   :  { %73 = vrsqrt.f32 %v24_v15  ;;  %vm27_vm1 = vcmp.eq.f32.partialorder %v24_v15, inf  ;;  %v30_v19 = vand.u32 2147483648, %v24_v15  ;;  %vm29_vm2 = vcmp.eq.f32.partialorder %v24_v15, 0.0 }
 0x111   :  { %75 = vpow2.f32 %v48_v30 }
 0x11d   :  { %v74_v16 = vpop.eup %73 }
 0x11e   :  { %v26_v17 = vmul.f32 %v74_v16, %v24_v15  ;;  %v76_v32 = vpop.eup %75 }
 0x120   :  { %v28_v18 = vsel %vm27_vm1, %v24_v15, %v26_v17 }
 0x121   :  { %v31_v20 = vsel %vm29_vm2, %v30_v19, %v28_v18 }
 0x122   :  { %v33_v21 = vmul.f32 0.19866933, %v31_v20 }
 0x124   :  { %v34_v23 = vsub.f32 %v32_v22, %v33_v21 }
 0x126   :  { %v37_v25 = vsel %vm35_vm3, %v34_v23, %v68_v24 }
 0x127   :  { %v51_v27 = vsub.f32 %v37_v25, %v39_v7  ;;  %v60_v40 = vmul.f32 32.0, %v37_v25 }
 0x129   :  { %v52_v29 = vmul.f32 32.0, %v51_v27 }
 0x12b   :  { %v53_v31 = vmul.f32 1.442695, %v52_v29 }
 0x12d   :  { %77 = vpow2.f32 %v53_v31 }
 0x13a   :  { %v78_v35 = vpop.eup %77 }
 0x148   :  { %v45_v33 = vpop.xlane.xlu1 %44 }
 0x149   :  { %v50_v34 = vsub.f32 %v45_v33, %v76_v32 }
 0x14b   :  { %v55_v36 = vadd.f32 %v78_v35, %v50_v34 }
 0x14d   :  { %79 = vlog2.f32 %v55_v36 }
 0x15a   :  { %v80_v37 = vpop.eup %79 }
 0x15b   :  { %v58_v39 = vmul.f32 0.6931472, %v80_v37 }
 0x15d   :  { %v59_v41 = vadd.f32 %v58_v39, %v56_v38 }
 0x15f   :  { %v61_v42 = vsub.f32 %v59_v41, %v60_v40 }
 0x161   :  { %63 = vst.msk [vmem:[%s108_s2] sm:$0xff] %vm62_vm4, %v61_v42 }

</bundles_post_ra>
